<compile_context>
chip_gen: v6e
topology: v6e:2x2x1
jax: 0.10.0
libtpu: 0.0.40
codegen_flags: <defaults>
</compile_context>

<pallas_src>
import functools

import jax
import jax.numpy as jnp
from jax.experimental import pallas as pl
from jax.experimental.pallas import tpu as pltpu

HIDDEN = 768
NUM_CLASSES = 3
PAD_N = 128          # lane-dense class dim (3 padded to one full lane width)
BN_EPS = 1e-5


def _round_up(x: int, m: int) -> int:
    return ((x + m - 1) // m) * m


def _default_tanh_dtype():
    """bf16 tanh on chips with a bf16 EUP (v6e/v7x); f32 on older chips (v5e)."""
    try:
        kind = jax.devices()[0].device_kind.lower()
    except Exception:
        kind = ""
    if any(v in kind for v in ("v2", "v3", "v4", "v5")):
        return jnp.float32
    return jnp.bfloat16


_TANH_DTYPE = _default_tanh_dtype()


def _probe_single_buffer_support() -> bool:
    """pipeline_mode=pl.Buffered(1) keeps grid-invariant operands single-buffered
    (frees ~1.3 MiB of VMEM here). Probe once at import so older Mosaic/JAX
    versions fall back to default double-buffering instead of failing."""
    def _copy(x_ref, o_ref):
        o_ref[...] = x_ref[...]

    try:
        fn = pl.pallas_call(
            _copy,
            out_shape=jax.ShapeDtypeStruct((16, 128), jnp.float32),
            grid_spec=pltpu.PrefetchScalarGridSpec(
                num_scalar_prefetch=0,
                grid=(2,),
                in_specs=[pl.BlockSpec((8, 128), lambda i: (0, 0),
                                       pipeline_mode=pl.Buffered(1))],
                out_specs=pl.BlockSpec((8, 128), lambda i: (i, 0)),
            ),
        )
        jax.block_until_ready(fn(jnp.zeros((8, 128), jnp.float32)))
        return True
    except Exception:
        return False


_SINGLE_BUFFER_OK = _probe_single_buffer_support()


def _resident_spec(shape):
    """BlockSpec for operands whose block index is constant across the grid."""
    if _SINGLE_BUFFER_OK:
        return pl.BlockSpec(shape, lambda i: (0, 0), pipeline_mode=pl.Buffered(1))
    return pl.BlockSpec(shape, lambda i: (0, 0))


# ----------------------------------------------------------------------------
# Pallas kernel: fused [pooler GEMM (768x768) + tanh] + [BN-folded head GEMM]
# ----------------------------------------------------------------------------
def _make_fused_kernel(tanh_dtype):
    def kernel(x_ref, pw_ref, pb_ref, w_ref, b_ref, o_ref):
        # x_ref : (TILE_B, 768) bf16   pooled embeddings
        # pw_ref: (768, 768)    bf16   pooler weight (grid-resident)
        # pb_ref: (1, 768)      f32    pooler bias
        # w_ref : (768, 128)    bf16   BN-folded head weight, zero-padded 3 -> 128
        # b_ref : (1, 128)      f32    BN-folded head bias,  zero-padded 3 -> 128
        # o_ref : (TILE_B, 128) bf16   padded logits (lane-dense unmasked store)
        h = jnp.dot(x_ref[...], pw_ref[...], preferred_element_type=jnp.float32)
        h = h + pb_ref[...]
        # tanh runs on the EUP; bf16 on v6e/v7x (native bf16 EUP), f32 on v5e.
        cls = jnp.tanh(h.astype(tanh_dtype)).astype(jnp.bfloat16)
        logits = jnp.dot(cls, w_ref[...], preferred_element_type=jnp.float32)
        o_ref[...] = (logits + b_ref[...]).astype(o_ref.dtype)
    return kernel


def _choose_tile_b(B: int, target: int = 1024) -> int:
    """Batch tile: multiple of 16 (bf16 sublane packing). When B is large enough,
    guarantee >= 2 grid steps with 128-aligned tiles so v7x's two TensorCores
    both get work. Capped at `target` (1024 ~= 11 MiB VMEM; fits v5e's 16 MiB
    scoped default and amortizes the ~0.35 us per-step pipeline overhead)."""
    if B < 256:
        return _round_up(B, 16)
    half = _round_up((B + 1) // 2, 128)
    return max(128, min(target, half))


def classifier_forward_pallas(pooled, pooler_w, pooler_b, head_w, head_b,
                              *, tile_b=None):
    """pooled (B,768) bf16 -> (B,3) f32 logits via one fused Pallas kernel."""
    B = pooled.shape[0]
    if tile_b is None:
        tile_b = _choose_tile_b(B)
    tile_b = _round_up(int(tile_b), 16)

    B_pad = _round_up(B, tile_b)
    x = pooled
    if B_pad != B:
        x = jnp.pad(x, ((0, B_pad - B), (0, 0)))

    out = pl.pallas_call(
        _make_fused_kernel(_TANH_DTYPE),
        out_shape=jax.ShapeDtypeStruct((B_pad, PAD_N), jnp.bfloat16),
        grid_spec=pltpu.PrefetchScalarGridSpec(
            num_scalar_prefetch=0,
            grid=(B_pad // tile_b,),
            in_specs=[
                pl.BlockSpec((tile_b, HIDDEN), lambda i: (i, 0)),  # pooled x
                _resident_spec((HIDDEN, HIDDEN)),                  # pooler_w
                _resident_spec((1, HIDDEN)),                       # pooler_b
                _resident_spec((HIDDEN, PAD_N)),                   # folded head w
                _resident_spec((1, PAD_N)),                        # folded head b
            ],
            out_specs=pl.BlockSpec((tile_b, PAD_N), lambda i: (i, 0)),
        ),
        compiler_params=pltpu.CompilerParams(
            dimension_semantics=("parallel",),
            vmem_limit_bytes=32 * 1024 * 1024,
        ),
    )(x, pooler_w, pooler_b, head_w, head_b)

    # Strip batch padding + zero class columns; return f32 like the torch head.
    return out[:B, :NUM_CLASSES].astype(jnp.float32)


# ----------------------------------------------------------------------------
# One-time parameter prep (hoisted out of the per-call path)
# ----------------------------------------------------------------------------
@jax.jit
def prepare_inference_params(params):
    """Fold eval-mode BatchNorm1d into the Linear head (exact in f32), zero-pad
    the class dim 3 -> 128 for lane-dense stores, and cast weights to bf16."""
    scale = params["bn_gamma"] * jax.lax.rsqrt(params["bn_var"] + BN_EPS)     # (3,)
    w_fold = params["fc_w"] * scale[None, :]                                  # (768,3)
    b_fold = (params["fc_b"] - params["bn_mean"]) * scale + params["bn_beta"]

    w_pad = jnp.zeros((HIDDEN, PAD_N), jnp.bfloat16)
    w_pad = w_pad.at[:, :NUM_CLASSES].set(w_fold.astype(jnp.bfloat16))
    b_pad = jnp.zeros((1, PAD_N), jnp.float32).at[0, :NUM_CLASSES].set(b_fold)

    return {
        "embedding": params["embedding"],
        "pooler_w": params["pooler_w"].astype(jnp.bfloat16),
        "pooler_b": params["pooler_b"].reshape(1, HIDDEN).astype(jnp.float32),
        "head_w": w_pad,
        "head_b": b_pad,
    }


# ----------------------------------------------------------------------------
# Deterministic backbone stub (plain JAX glue): tokens -> (B, 768) pooled vec.
# TODO(synk): the real pretrained transformer backbone has no clean single-kernel
# Pallas equivalent; this stub reproduces the interface (the pooler GEMM + tanh
# that follow it ARE fused into the Pallas kernel above).
# ----------------------------------------------------------------------------
def masked_mean_pool(embedding, input_ids, attention):
    emb = embedding[input_ids]                                # (B, S, 768) f32
    mask = attention.astype(jnp.float32)[..., None]           # (B, S, 1)
    pooled = (emb * mask).sum(axis=1) / jnp.maximum(mask.sum(axis=1), 1.0)
    return pooled.astype(jnp.bfloat16)                        # bf16 straight into kernel


def init_params(key, vocab_size=32):
    ks = jax.random.split(key, 5)
    return {
        "embedding": jax.random.normal(ks[0], (vocab_size, HIDDEN), jnp.float32) * 0.02,
        "pooler_w": jax.random.normal(ks[1], (HIDDEN, HIDDEN), jnp.float32) * 0.02,
        "pooler_b": jnp.zeros((HIDDEN,), jnp.float32),
        # nn.Linear(768, 3)
        "fc_w": jax.random.normal(ks[2], (HIDDEN, NUM_CLASSES), jnp.float32) * 0.02,
        "fc_b": jax.random.normal(ks[3], (NUM_CLASSES,), jnp.float32) * 0.02,
        # nn.BatchNorm1d(3) — eval-mode running stats (deterministic)
        "bn_gamma": jnp.ones((NUM_CLASSES,), jnp.float32),
        "bn_beta": jnp.zeros((NUM_CLASSES,), jnp.float32),
        "bn_mean": jax.random.normal(ks[4], (NUM_CLASSES,), jnp.float32) * 0.1,
        "bn_var": jnp.ones((NUM_CLASSES,), jnp.float32),
    }


@functools.partial(jax.jit, static_argnames=("tile_b",))
def sentiment_classifier_forward(prepared, input_ids, attention, tile_b=None):
    pooled = masked_mean_pool(prepared["embedding"], input_ids, attention)  # (B,768) bf16
    # Dropout(0.5) -> identity at inference.
    return classifier_forward_pallas(
        pooled, prepared["pooler_w"], prepared["pooler_b"],
        prepared["head_w"], prepared["head_b"], tile_b=tile_b)              # (B, 3) f32


def reference_forward(params, input_ids, attention):
    emb = params["embedding"][input_ids]
    mask = attention.astype(jnp.float32)[..., None]
    pooled = (emb * mask).sum(axis=1) / jnp.maximum(mask.sum(axis=1), 1.0)
    cls_hs = jnp.tanh(pooled @ params["pooler_w"] + params["pooler_b"])
    z = cls_hs @ params["fc_w"] + params["fc_b"]
    return (z - params["bn_mean"]) * jax.lax.rsqrt(params["bn_var"] + BN_EPS) \
        * params["bn_gamma"] + params["bn_beta"]


if __name__ == "__main__":
    key = jax.random.PRNGKey(0)
    pkey, ikey = jax.random.split(key)

    B, S, VOCAB = 8, 16, 32
    params = init_params(pkey, vocab_size=VOCAB)
    input_ids = jax.random.randint(ikey, (B, S), 0, VOCAB, dtype=jnp.int32)
    attention = jnp.ones((B, S), dtype=jnp.int32).at[:, S // 2:].set(
        jnp.arange(S // 2, dtype=jnp.int32)[None, :] % 2)  # mix of 0/1 mask

    prepared = prepare_inference_params(params)   # one-time BN fold + pad + bf16 cast
    out = sentiment_classifier_forward(prepared, input_ids, attention)
    out = jax.block_until_ready(out)

    ref = reference_forward(params, input_ids, attention)
    assert out.shape == (B, NUM_CLASSES), out.shape
    # bf16 MXU operands / bf16 tanh / bf16 store vs a pure-f32 reference.
    assert jnp.allclose(out, ref, atol=1e-2, rtol=5e-2), \
        f"max abs err {jnp.max(jnp.abs(out - ref))}"

    print("KERNEL_OK")
</pallas_src>

<mosaic_0001>
module attributes {stable_mosaic.version = 11 : i64} {
  func.func @_copy(%arg0: i32, %arg1: memref<8x128xf32, #tpu.memory_space<vmem>>, %arg2: memref<8x128xf32, #tpu.memory_space<vmem>>) attributes {dimension_semantics = [#tpu.dimension_semantics<arbitrary>], iteration_bounds = array<i64: 2>, scalar_prefetch = 0 : i64, scratch_operands = 0 : i64, tpu.core_type = #tpu.core_type<tc>, window_params = [{pipeline_mode = #tpu.pipeline_mode<synchronous>, transform_indices = @transform_0, window_bounds = array<i64: 8, 128>}, {transform_indices = @transform_1, window_bounds = array<i64: 8, 128>}]} {
    %c0 = arith.constant 0 : index
    %c0_0 = arith.constant 0 : index
    %0 = vector.load %arg1[%c0, %c0_0] : memref<8x128xf32, #tpu.memory_space<vmem>>, vector<8x128xf32>
    %c0_1 = arith.constant 0 : index
    %c0_2 = arith.constant 0 : index
    %1 = vector.load %arg2[%c0_1, %c0_2] : memref<8x128xf32, #tpu.memory_space<vmem>>, vector<8x128xf32>
    tpu.vector_store %arg2[%c0_1, %c0_2], %0 {strides = array<i32>} : memref<8x128xf32, #tpu.memory_space<vmem>>, vector<8x128xf32>,
    return
  }
  func.func @transform_0(%arg0: i32) -> (i32, i32) {
    %c0_i32 = arith.constant 0 : i32
    %c0_i32_0 = arith.constant 0 : i32
    %c0_i32_1 = arith.constant 0 : i32
    return %c0_i32, %c0_i32_0 : i32, i32
  }
  func.func @transform_1(%arg0: i32) -> (i32, i32) {
    %c0_i32 = arith.constant 0 : i32
    %c0_i32_0 = arith.constant 0 : i32
    return %arg0, %c0_i32 : i32, i32
  }
}

</mosaic_0001>

<bundles_post_ra>
// kernel: tpu_custom_call.1
= control target key start
LH: loop header
LB: loop body
LE: loop exit
PB: predicated region body
PF: predicated region fallthrough
CT: control target
= control target key end

     0   :  { %6 = vsyncpa [#allocation3], 0  ;;  %s453_s0 = inlined_call_operand.hbm [shape: f32[8,128], index: 0, kind: input, shape index: {}]   ;;  %s454_s1 = inlined_call_operand.hbm [shape: f32[16,128], index: 1, kind: output, shape index: {}]  }
   0x1   :  { %7 = vsyncpa [#allocation4], 0 }
   0x2   :  { %9 = vsyncpa [#allocation4 + $0x1], 0  ;;  %s347_s6 = smov 0   ;;  %s349_s7 = smov 0  }
   0x3   :  { %s351_s8 = smov 0   ;;  %s353_s9 = smov 0  }
   0x4 LB: > { %s368_s10 = sadd.s32 4294967295, %s333_s9   ;;  %s183_s11 = sadd.s32 4294967294, %s333_s9   ;;  %s333_s9 = sphi %s353_s9, %s462_s9   ;;  %s329_s8 = sphi %s351_s8, %s461_s8   ;;  %s325_s7 = sphi %s349_s7, %s460_s7   ;;  %s321_s6 = sphi %s347_s6, %s459_s6  }
   0x5   : > { %s372_s12 = sadd.s32 1, %s333_s9   ;;  %s43_s13 = sadd.s32 1, %s329_s8 }
   0x6   : > { %s40_s14 = ssub.s32 %s333_s9, %s372_s12  ;;  %p53_p0 = scmp.ne.s32.totalorder %s329_s8, %s325_s7 }
   0x7   : > { %p41_p1 = scmp.eq.s32.totalorder %s40_s14, 0  ;;  %p54_p2 = scmp.eq.s32.totalorder %s368_s10, 1 }
   0x8   : > { %p59_p3 = scmp.ne.s32.totalorder %s325_s7, %s321_s6  ;;  %p60_p4 = scmp.eq.s32.totalorder %s183_s11, 1 }
   0x9   : > { %s383_s15 = scalar_select %p41_p1, %s329_s8, %s43_s13  }
   0xa   : > { %p385_p5 = por %p54_p2, %p53_p0  ;;  %p389_p6 = por %p60_p4, %p59_p3 }
   0xb   : > { %p184_p7 = scmp.ge.s32.totalorder %s333_s9, 1  ;;  %p67_p8 = scmp.lt.s32.totalorder %s333_s9, 3 }
   0xc   : > { %s456_s17 = scalar_select %p389_p6, 1, 0 }
   0xd   : > { %p207_p9 = scmp.eq.s32.totalorder %s368_s10, 0  ;;  %p396_p10 = pnand %p184_p7, %p67_p8 }
   0xe   : > { %s335_s19 = smov [#allocation2]  }
   0xf   : > { %s80_s20 = sshll.u32 %s335_s19, 4  ;;  %p199_p11 = pneg %p396_p10  ;;  %s81_s20 = int_to_ptr.vmem [resolvable:$true] %s80_s20 }
  0x10   : > { %s254_s21 = scalar_lea.vmem %s81_s20, 128  ;;  %p262_p3 = scmp.lt.s32.totalorder %s81_s20, %s81_s20 }
  0x11   : > { %p200_p12 = pnand %p207_p9, %p199_p11  ;;  %p255_p0 = scmp.ne.s32.totalorder %s81_s20, %s254_s21 }
  0x12   : > { %p263_p4 = scmp.lt.s32.totalorder %s254_s21, %s254_s21 }
  0x13   : > { %p245_p13 = pneg %p200_p12 }
  0x14   : > { %p264_p6 = por %p263_p4, %p262_p3 }
  0x15   : > { %p257_p1 = pnand %p255_p0, %p245_p13 }
  0x17   : > { %p258_p2 = pneg %p257_p1 }
  0x19   : > { %p265_p7 = pnand %p264_p6, %p258_p2 }
  0x1b   : > { %268 = shalt.err (!%p265_p7)
}
  0x1c   : > { %202 = dma.hbm_to_vmem [thread:$0]  (!%p200_p12), %s453_s0, 128, %s81_s20, [#allocation3]  }
  0x1d   : > { %93 = sbr.rel (%p396_p10) target bundleno = 60 (0x3c), region = 24 }
  0x22   : > { %312 = dma.done.wait (%p207_p9), [#allocation3], 128  }
  0x23   : > { %314 = vsyncadd (%p207_p9), [#allocation3], 4294967168  ;;  %s105_s24 = sand.u32 1, %s325_s7   ;;  %s190_s28 = sshll.u32 %s368_s10, 7  ;;  %v108_v0 = vld [vmem:[#allocation2] sm:$0xff] }
  0x24   : > { %s188_s25 = sshll.u32 %s105_s24, 3  ;;  %s122_s2 = scalar_lea.hbm %s454_s1, %s190_s28 }
  0x25   : > { %s107_s26 = scalar_lea.vmem [#allocation5], %s188_s25  ;;  %s111_s3 = scalar_lea.sflag [#allocation4], %s105_s24 }
  0x26   : > { %s124_s27 = sshll.u32 %s107_s26, 4  ;;  %109 = vst [vmem:[%s107_s26] sm:$0xff] %v108_v0  ;;  %s336_s5 = smov [#allocation5]   ;;  %s415_s27 = int_to_ptr.vmem [resolvable:$true] %s124_s27 }
  0x27   : > { %s269_s4 = scalar_lea.vmem %s415_s27, 128  ;;  %s273_s11 = sshll.u32 %s336_s5, 4  ;;  %s274_s11 = int_to_ptr.vmem [resolvable:$false] %s273_s11 }
  0x28   : > { %p270_p6 = scmp.ne.s32.totalorder %s415_s27, %s269_s4  ;;  %s275_s10 = scalar_lea.vmem %s274_s11, 256 }
  0x29   : > { %p276_p10 = scmp.lt.s32.totalorder %s415_s27, %s274_s11  ;;  %p277_p11 = scmp.lt.s32.totalorder %s275_s10, %s269_s4 }
  0x2a   : > { %p271_p8 = pnand %p270_p6, %p385_p5 }
  0x2b   : > { %p278_p12 = por %p277_p11, %p276_p10 }
  0x2c   : > { %p272_p9 = pneg %p271_p8 }
  0x2e   : > { %p279_p13 = pnand %p278_p12, %p272_p9 }
  0x30   : > { %282 = shalt.err (!%p279_p13)
}
  0x31   : > { %s283_s13 = scalar_lea.hbm %s122_s2, 128  ;;  %s287_s19 = scalar_lea.hbm %s454_s1, 256 }
  0x32   : > { %p284_p0 = scmp.ne.s32.totalorder %s122_s2, %s283_s13  ;;  %p288_p3 = scmp.lt.s32.totalorder %s122_s2, %s454_s1 }
  0x33   : > { %p289_p4 = scmp.lt.s32.totalorder %s287_s19, %s283_s13 }
  0x34   : > { %p285_p1 = pnand %p284_p0, %p385_p5 }
  0x35   : > { %p290_p7 = por %p289_p4, %p288_p3 }
  0x36   : > { %p286_p2 = pneg %p285_p1 }
  0x38   : > { %p291_p6 = pnand %p290_p7, %p286_p2 }
  0x3a   : > { %294 = shalt.err (!%p291_p6)
}
  0x3b   : > { %197 = dma.vmem_to_hbm [thread:$0]  (%p385_p5), %s415_s27, 128, %s122_s2, %s111_s3  }
  0x3c PF: > { %p209_p8 = scmp.ge.s32.totalorder %s333_s9, 2  ;;  %s136_s22 = sand.u32 1, %s321_s6  }
  0x3d   : > { %p458_p9 = scmp.ne.s32.totalorder %s456_s17, 0  ;;  %s137_s23 = scalar_lea.sflag [#allocation4], %s136_s22 }
  0x3f   : > { %p204_p10 = pnand %p209_p8, %p458_p9 }
  0x41   : > { %p205_p11 = pneg %p204_p10 }
  0x43   : > { %316 = dma.done.wait (%p205_p11), %s137_s23, 128  }
  0x44   : > { %318 = vsyncadd (%p205_p11), %s137_s23, 4294967168  ;;  %p12_p12 = scmp.ge.s32.totalorder %s372_s12, 4   ;;  %s459_s6 = smov %s325_s7 }
  0x45   : > { %s460_s7 = smov %s329_s8  ;;  %s461_s8 = smov %s383_s15 }
  0x46   : > { %s462_s9 = smov %s372_s12  ;;  %14 = sbr.rel (!%p12_p12) target bundleno = 4 (0x4), region = 61 }
  0x4b   :  { %142 = vsyncpa [#allocation3], 1 }
  0x4c   :  { %144 = vsyncpa [#allocation3 + $0x1], 1 }
  0x4d   :  { %145 = vsyncpa [#allocation4], 1 }
  0x4e   :  { %147 = vsyncpa [#allocation4 + $0x1], 1 }

</bundles_post_ra>
